<compile_context>
chip_gen: v7x
topology: tpu7x:2x2x1
jax: 0.10.0
libtpu: 0.0.40
codegen_flags: <defaults>
</compile_context>

<pallas_src>
import functools

import jax
import jax.numpy as jnp
from jax.experimental import pallas as pl
from jax.experimental.pallas import tpu as pltpu

LANES = 128   # one vreg row; `num` is tiny, a single tile suffices per instance


# --------------------------------------------------------------------------- #
# Single-instance kernel: (2, 128) f32 in VMEM -> scalar out via SMEM.
# --------------------------------------------------------------------------- #
def _awl_kernel(x_ref, out_ref, *, num):
    # x_ref: (2, LANES) f32 in VMEM. Row 0 = losses, row 1 = params.
    x = x_ref[...]                              # single vld: (2,128) f32 = one vreg
    losses = x[0:1, :]                          # (1, LANES)
    p = x[1:2, :]                               # (1, LANES)
    p2 = p * p
    term = 0.5 * pl.reciprocal(p2, approx=False) * losses + jnp.log1p(p2)
    # Exact zero for padded lanes (lane >= num); `num` is a static Python int,
    # and every VLIW slot has slack here, so the mask is free.
    lane = jax.lax.broadcasted_iota(jnp.int32, term.shape, dimension=1)
    term = jnp.where(lane < num, term, 0.0)
    out_ref[0, 0] = jnp.sum(term)               # reduce-to-scalar into SMEM


@jax.jit
def _awl_call(losses, params):
    num = losses.shape[0]                       # static at trace time
    losses_p = jnp.pad(losses.astype(jnp.float32), (0, LANES - num))
    params_p = jnp.pad(params.astype(jnp.float32), (0, LANES - num),
                       constant_values=1.0)     # avoid 1/0 in (masked) padded lanes
    packed = jnp.stack([losses_p, params_p], axis=0)          # (2, LANES)
    out = pl.pallas_call(
        functools.partial(_awl_kernel, num=num),
        out_shape=jax.ShapeDtypeStruct((1, 1), jnp.float32),
        in_specs=[pl.BlockSpec(memory_space=pltpu.MemorySpace.VMEM)],
        out_specs=pl.BlockSpec(memory_space=pltpu.MemorySpace.SMEM),
        cost_estimate=pl.CostEstimate(flops=5 * LANES,
                                      transcendentals=LANES,
                                      bytes_accessed=2 * LANES * 4 + 4),
    )(packed)
    return out[0, 0]


def automatic_weighted_loss(losses, params):
    """losses: (num,) f32, params: (num,) f32 -> scalar f32."""
    num = losses.shape[0]
    assert params.shape[0] == num
    assert num <= LANES, "single-tile kernel; num must fit in one vreg row"
    return _awl_call(losses, params)


# --------------------------------------------------------------------------- #
# Batched variant (acts on the review's "fuse or batch" item): B instances per
# pallas_call. Grid over sublane-multiple row blocks; batch axis is "parallel"
# so it shards across both TensorCores on v7x.
# --------------------------------------------------------------------------- #
_BATCH_BLOCK = 8   # sublane multiple; bump to e.g. 512 for large-B production use


def _awl_batched_kernel(losses_ref, params_ref, out_ref, *, num):
    losses = losses_ref[...]                    # (BB, LANES)
    p = params_ref[...]                         # (BB, LANES)
    p2 = p * p
    term = 0.5 * pl.reciprocal(p2, approx=False) * losses + jnp.log1p(p2)
    lane = jax.lax.broadcasted_iota(jnp.int32, term.shape, dimension=1)
    term = jnp.where(lane < num, term, 0.0)
    out_ref[...] = jnp.sum(term, axis=1, keepdims=True)       # (BB, 1)


@jax.jit
def _awl_batched_call(losses, params):
    # losses: (B, num), params: (num,) shared across the batch.
    B, num = losses.shape
    BB = _BATCH_BLOCK
    Bp = ((B + BB - 1) // BB) * BB
    losses_p = jnp.zeros((Bp, LANES), jnp.float32).at[:B, :num].set(
        losses.astype(jnp.float32))
    params_p = jnp.ones((Bp, LANES), jnp.float32).at[:, :num].set(
        params.astype(jnp.float32))
    out = pl.pallas_call(
        functools.partial(_awl_batched_kernel, num=num),
        out_shape=jax.ShapeDtypeStruct((Bp, 1), jnp.float32),
        grid=(Bp // BB,),
        in_specs=[pl.BlockSpec((BB, LANES), lambda b: (b, 0)),
                  pl.BlockSpec((BB, LANES), lambda b: (b, 0))],
        out_specs=pl.BlockSpec((BB, 1), lambda b: (b, 0)),
        compiler_params=pltpu.CompilerParams(dimension_semantics=("parallel",)),
        cost_estimate=pl.CostEstimate(flops=5 * Bp * LANES,
                                      transcendentals=Bp * LANES,
                                      bytes_accessed=2 * Bp * LANES * 4 + Bp * 4),
    )(losses_p, params_p)
    return out[:B, 0]


def automatic_weighted_loss_batched(losses, params):
    """losses: (B, num), params: (num,) -> (B,) f32 (one forward per row)."""
    assert losses.ndim == 2 and params.shape[0] == losses.shape[1]
    assert losses.shape[1] <= LANES
    return _awl_batched_call(losses, params)


# --------------------------------------------------------------------------- #
# Pure-JAX reference mirroring the PyTorch forward loop.
# --------------------------------------------------------------------------- #
def automatic_weighted_loss_ref(losses, params):
    loss_sum = 0.0
    for i in range(losses.shape[0]):
        loss_sum = (loss_sum
                    + 0.5 / params[i] ** 2 * losses[i]
                    + jnp.log(1.0 + params[i] ** 2))
    return loss_sum


# TODO(synk): in production, fuse this reduction into the kernel that produces the
# per-task losses instead of a standalone call — even batched, the op is pure
# launch/DMA overhead for <1 KiB of data.

if __name__ == "__main__":
    num = 2
    key = jax.random.PRNGKey(0)

    # Parameters: torch.ones(num) in __init__ (deterministic).
    params = jnp.ones((num,), dtype=jnp.float32)
    # Example "loss" scalars fed to forward(*x).
    losses = jax.random.uniform(key, (num,), dtype=jnp.float32, minval=0.1, maxval=2.0)

    out = automatic_weighted_loss(losses, params)
    out = jax.block_until_ready(out)
    ref = automatic_weighted_loss_ref(losses, params)
    assert jnp.allclose(out, ref, rtol=1e-5, atol=1e-5), (out, ref)

    # Batched variant: B independent forward() calls in one pallas_call.
    B = 5
    losses_b = jax.random.uniform(jax.random.PRNGKey(1), (B, num),
                                  dtype=jnp.float32, minval=0.1, maxval=2.0)
    out_b = automatic_weighted_loss_batched(losses_b, params)
    out_b = jax.block_until_ready(out_b)
    ref_b = jnp.stack([automatic_weighted_loss_ref(losses_b[i], params)
                       for i in range(B)])
    assert jnp.allclose(out_b, ref_b, rtol=1e-5, atol=1e-5), (out_b, ref_b)

    print("KERNEL_OK")
</pallas_src>

<mosaic_0001>
module attributes {stable_mosaic.version = 11 : i64} {
  func.func @_awl_kernel(%arg0: memref<2x128xf32, #tpu.memory_space<vmem>>, %arg1: memref<1x1xf32, #tpu.memory_space<smem>>) attributes {dimension_semantics = [], scalar_prefetch = 0 : i64, scratch_operands = 0 : i64, tpu.core_type = #tpu.core_type<tc>} {
    %c0 = arith.constant 0 : index
    %c0_0 = arith.constant 0 : index
    %0 = vector.load %arg0[%c0, %c0_0] : memref<2x128xf32, #tpu.memory_space<vmem>>, vector<2x128xf32>
    %1 = vector.extract_strided_slice %0 {offsets = [0, 0], sizes = [1, 128], strides = [1, 1]} : vector<2x128xf32> to vector<1x128xf32>
    %2 = vector.extract_strided_slice %0 {offsets = [1, 0], sizes = [1, 128], strides = [1, 1]} : vector<2x128xf32> to vector<1x128xf32>
    %3 = arith.mulf %2, %2 : vector<1x128xf32>
    %4 = tpu.reciprocal %3 : vector<1x128xf32> -> vector<1x128xf32>
    %cst = arith.constant 5.000000e-01 : f32
    %5 = vector.broadcast %cst : f32 to vector<1x128xf32>
    %6 = arith.mulf %5, %4 : vector<1x128xf32>
    %7 = arith.mulf %6, %1 : vector<1x128xf32>
    %8 = math.log1p %3 : vector<1x128xf32>
    %9 = arith.addf %7, %8 : vector<1x128xf32>
    %10 = tpu.iota {dimensions = array<i32: 1>} : vector<1x128xi32>
    %c2_i32 = arith.constant 2 : i32
    %11 = vector.broadcast %c2_i32 : i32 to vector<1x128xi32>
    %12 = arith.cmpi slt, %10, %11 : vector<1x128xi32>
    %cst_1 = arith.constant 0.000000e+00 : f32
    %13 = vector.broadcast %cst_1 : f32 to vector<1x128xf32>
    %14 = arith.select %12, %9, %13 : vector<1x128xi1>, vector<1x128xf32>
    %15 = vector.shape_cast %14 : vector<1x128xf32> to vector<1x1x128xf32>
    %cst_2 = arith.constant dense<0.000000e+00> : vector<1xf32>
    %16 = vector.multi_reduction <add>, %15, %cst_2 [1, 2] : vector<1x1x128xf32> to vector<1xf32>
    %17 = vector.shape_cast %16 : vector<1xf32> to vector<1x1x1xf32>
    %18 = vector.extract %17[0, 0, 0] : f32 from vector<1x1x1xf32>
    %c0_3 = arith.constant 0 : index
    %c0_4 = arith.constant 0 : index
    %19 = memref.load %arg1[%c0_3, %c0_4] : memref<1x1xf32, #tpu.memory_space<smem>>
    memref.store %18, %arg1[%c0_3, %c0_4] : memref<1x1xf32, #tpu.memory_space<smem>>
    return
  }
}

</mosaic_0001>

<bundles_post_ra>
// kernel: _awl_call.1
= control target key start
LH: loop header
LB: loop body
LE: loop exit
PB: predicated region body
PF: predicated region fallthrough
CT: control target
= control target key end

     0   :  { %s105_s0 = inlined_call_operand.vmem [shape: f32[2,128], index: 0, kind: input, shape index: {}]   ;;  %s106_s1 = inlined_call_operand.hbm [shape: f32[1,1], index: 1, kind: output, shape index: {}]  }
   0x1   :  { %v9_v0 = vld [vmem:[%s105_s0] sm:$0x3] }
   0x2   :  { %6 = vsyncpa [#allocation3], 0  ;;  %v10_v1 = vmul.f32 %v9_v0, %v9_v0  ;;  %v27_v5 = vlaneseq  ;;  %v14_v7 = vrot.slane %v9_v0, 7  ;;  %vm34_vm2 = vcmask 1040384   ;;  %s67_s10 = scalar_lea.hbm %s106_s1, 16 }
   0x3   :  { %p68_p0 = scmp.ne.s32.totalorder %s106_s1, %s67_s10  ;;  %p71_p1 = scmp.lt.u32.totalorder %s67_s10, %s106_s1 }
   0x4   :  { %63 = vrcp.f32 %v10_v1  ;;  %v17_v2 = vadd.f32 1.0, %v10_v1  ;;  %v20_v3 = vmul.f32 -0.5, %v10_v1  ;;  %v23_v6 = vand.u32 2147483647, %v10_v1 }
   0x5   :  { %v28_v11 = vand.u32 127, %v27_v5  ;;  %p73_p2 = pnand %p71_p1, %p68_p0 }
   0x6   :  { %65 = vlog2.f32 %v17_v2  ;;  %v21_v4 = vadd.f32 1.0, %v20_v3  ;;  %vm24_vm0 = vcmp.lt.f32.partialorder %v23_v6, 0.0004427343 }
   0x7   :  { %vm29_vm1 = vcmp.lt.s32.totalorder %v28_v11, 2 }
   0x8   :  { %v22_v10 = vmul.f32 %v21_v4, %v10_v1 }
   0xe   :  { %v64_v8 = vpop.eup %63 }
   0xf   :  { %v12_v9 = vmul.f32 0.5, %v64_v8 }
  0x10   :  { %v66_v12 = vpop.eup %65 }
  0x11   :  { %v16_v13 = vmul.f32 %v14_v7, %v12_v9  ;;  %v19_v14 = vmul.f32 0.6931472, %v66_v12 }
  0x13   :  { %v25_v15 = vsel %vm24_vm0, %v22_v10, %v19_v14 }
  0x14   :  { %v26_v16 = vadd.f32 %v25_v15, %v16_v13 }
  0x16   :  { %v30_v17 = vsel %vm29_vm1, %v26_v16, 0.0 }
  0x17   :  { %v32_v18 = vrot.slane %v30_v17, 1 }
  0x19   :  { %v35_v19 = vsel %vm34_vm2, %v32_v18, 0.0 }
  0x1a   :  { %36 = vadd.xlane.f32.xlu0 %v35_v19 }
  0xa7   :  { %v37_v20 = vpop.xlane.xlu0 %36 }
  0xa8   :  { %v38_v21 = vrot.slane %v37_v20, 4 }
  0xaa   :  { %v39_v22 = vadd.f32 %v38_v21, %v37_v20 }
  0xac   :  { %v40_v23 = vrot.slane %v39_v22, 2 }
  0xae   :  { %v41_v24 = vadd.f32 %v40_v23, %v39_v22 }
  0xb0   :  { %v42_v25 = vrot.slane %v41_v24, 1 }
  0xb2   :  { %v43_v26 = vadd.f32 %v42_v25, %v41_v24 }
  0xb4   :  { %60 = vpush %v43_v26 }
  0xe5   :  { %s61_s0 = spop %60 }
  0xe6   :  { %46 = sst [smem:[#allocation2]] %s61_s0 }
  0xe7   :  { %76 = shalt.err (!%p73_p2)
}
  0xe8   :  { %s79_s15 = smov [#allocation2]  }
  0xe9   :  { %54 = dma.smem_to_hbm %s79_s15, 16, %s106_s1, [#allocation3]  }
  0xea   :  { %77 = dma.done.wait [#allocation3], 16  }
  0xeb   :  { %78 = vsyncadd [#allocation3], 4294967280 }
  0xec   :  { %58 = sfence }
  0xed   :  { %59 = vsyncpa [#allocation3], 1 }

</bundles_post_ra>
